<compile_context>
chip_gen: v7x
topology: tpu7x:2x2x1
jax: 0.10.0
libtpu: 0.0.40
codegen_flags: <defaults>
</compile_context>

<pallas_src>
import functools
import math

import jax
import jax.numpy as jnp
from jax import lax
from jax.experimental import pallas as pl
from jax.experimental.pallas import tpu as pltpu


def _round_up(x, n):
    return ((x + n - 1) // n) * n


def _embedding_kernel(ids_ref, emb_hbm, o_ref, sems, *,
                      scale, tm, window, num_valid, guarded):
    """Gather `tm` embedding rows via a rolling DMA window, scale, store.

    ids_ref : SMEM (m_pad,) int32 token ids (scalar-prefetched)
    emb_hbm : HBM  (vocab, d_pad) embedding table (raw ref, manual DMA)
    o_ref   : VMEM (tm, d_pad) output tile -- rows are DMA'd straight into it
    sems    : DMA semaphore ring, shape (window,)
    """
    t = pl.program_id(0)
    base = t * tm

    def row_copy(r):
        # Identical descriptor (src / dst / sem) is used for start and wait.
        tok = ids_ref[base + r]
        return pltpu.make_async_copy(
            emb_hbm.at[pl.ds(tok, 1)],
            o_ref.at[pl.ds(r, 1)],
            sems.at[r % window],
        )

    def start(r):
        if guarded:
            @pl.when(base + r < num_valid)
            def _():
                row_copy(r).start()
        else:
            row_copy(r).start()

    def wait(r):
        if guarded:
            @pl.when(base + r < num_valid)
            def _():
                row_copy(r).wait()
        else:
            row_copy(r).wait()

    prime = min(window, tm)
    steady = max(tm - window, 0)

    # Prime: issue the first `prime` row gathers (fully unrolled, static r).
    for r in range(prime):
        start(r)

    # Steady state: wait row r, immediately reuse its sem slot for row
    # r + window.  Keeps `window` DMAs in flight at all times.
    if steady > 0:
        def _roll(r, c):
            wait(r)
            start(r + window)
            return c
        lax.fori_loop(0, steady, _roll, 0, unroll=8)

    # Drain the tail of the window (fully unrolled, static r).
    for r in range(steady, tm):
        wait(r)

    # Scale by sqrt(d_model) in f32 (single rounding for bf16 tables), then a
    # lane-dense (tm, d_pad) store back into the same output block.
    o_ref[...] = (o_ref[...].astype(jnp.float32) * scale).astype(o_ref.dtype)


def input_embedding(token_ids, embedding_table, *, row_tile=256, window=8):
    """token_ids: int array of any shape; embedding_table: (vocab, d_model).

    Returns embedding_table[token_ids] * sqrt(d_model),
    shape token_ids.shape + (d_model,).
    """
    orig_shape = token_ids.shape
    vocab, d_model = embedding_table.shape
    scale = math.sqrt(d_model)
    dtype = embedding_table.dtype
    dbytes = jnp.dtype(dtype).itemsize

    # --- token ids: flatten, clip (guards against OOB HBM DMAs), int32 ---
    ids = token_ids.reshape(-1).astype(jnp.int32)
    ids = jnp.clip(ids, 0, vocab - 1)
    m = int(ids.shape[0])

    # --- lane-dense rows: pad d_model up to a multiple of 128 ---
    d_pad = _round_up(d_model, 128)
    table = embedding_table
    if d_pad != d_model:
        table = jnp.pad(table, ((0, 0), (0, d_pad - d_model)))

    # --- tile size: amortize per-grid-step overhead, cap VMEM working set
    #     (output block is double-buffered; there is no staging buffer). ---
    vmem_budget = 8 * 1024 * 1024          # conservative even for v7x (64 MiB)
    max_tm = max(8, (vmem_budget // (2 * d_pad * dbytes)) // 8 * 8)
    tm = max(8, (min(row_tile, max_tm) // 8) * 8)
    if m <= tm:
        # Short inputs: prefer >= 2 tiles so both v7x TensorCores get work.
        tm = _round_up(pl.cdiv(m, 2), 8) if m > 8 else _round_up(max(m, 1), 8)
    n_tiles = pl.cdiv(m, tm)
    m_pad = n_tiles * tm
    if m_pad != m:
        ids = jnp.concatenate([ids, jnp.zeros((m_pad - m,), jnp.int32)])

    win = min(window, tm)
    kernel = functools.partial(
        _embedding_kernel,
        scale=scale, tm=tm, window=win,
        num_valid=m, guarded=(m_pad != m),
    )

    cost = pl.CostEstimate(
        flops=m * d_model,
        transcendentals=0,
        bytes_accessed=2 * m * d_pad * dbytes + m * 4,
    )

    out = pl.pallas_call(
        kernel,
        out_shape=jax.ShapeDtypeStruct((m_pad, d_pad), dtype),
        grid_spec=pltpu.PrefetchScalarGridSpec(
            num_scalar_prefetch=1,                         # ids -> SMEM
            grid=(n_tiles,),
            in_specs=[pl.BlockSpec(memory_space=pl.ANY)],  # table stays in HBM
            out_specs=pl.BlockSpec((tm, d_pad), lambda i, ids_ref: (i, 0)),
            scratch_shapes=[pltpu.SemaphoreType.DMA((win,))],
        ),
        compiler_params=pltpu.CompilerParams(
            dimension_semantics=("parallel",),   # token tiles are independent
            vmem_limit_bytes=32 * 1024 * 1024,
        ),
        cost_estimate=cost,
    )(ids, table)

    out = out[:m, :d_model]
    return out.reshape(*orig_shape, d_model)


if __name__ == "__main__":
    # Small shapes consistent with the module: batch=2, seq=8, vocab=128, d_model=32.
    B, S, V, D = 2, 8, 128, 32

    key = jax.random.PRNGKey(0)
    k_emb, k_ids = jax.random.split(key)

    # Deterministic params / inputs (nn.Embedding default init is N(0, 1)).
    table = jax.random.normal(k_emb, (V, D), jnp.float32)
    token_ids = jax.random.randint(k_ids, (B, S), 0, V, jnp.int32)

    out = input_embedding(token_ids, table)
    out = jax.block_until_ready(out)

    # Reference in plain JAX: embedding lookup scaled by sqrt(d_model).
    ref = table[token_ids] * math.sqrt(D)
    assert out.shape == (B, S, D)
    assert jnp.allclose(out, ref, atol=1e-6, rtol=1e-6), "mismatch vs reference"

    print("KERNEL_OK")
</pallas_src>

<mosaic_0001>
module attributes {stable_mosaic.version = 11 : i64} {
  func.func @_embedding_kernel(%arg0: i32, %arg1: memref<16xi32, #tpu.memory_space<smem>>, %arg2: memref<128x128xf32, #tpu.memory_space<any>>, %arg3: memref<8x128xf32, #tpu.memory_space<vmem>>, %arg4: memref<8x!tpu.dma_semaphore, #tpu.memory_space<semaphore_mem>>) attributes {dimension_semantics = [#tpu.dimension_semantics<parallel>], iteration_bounds = array<i64: 2>, scalar_prefetch = 1 : i64, scratch_operands = 1 : i64, tpu.core_type = #tpu.core_type<tc>, window_params = [{}, {transform_indices = @transform_1, window_bounds = array<i64: 8, 128>}]} {
    %c8_i32 = arith.constant 8 : i32
    %0 = arith.muli %arg0, %c8_i32 : i32
    %c0_i32 = arith.constant 0 : i32
    %1 = arith.addi %0, %c0_i32 : i32
    %2 = arith.index_cast %1 : i32 to index
    %3 = memref.load %arg1[%2] : memref<16xi32, #tpu.memory_space<smem>>
    %c0_i32_0 = arith.constant 0 : i32
    %c0_i32_1 = arith.constant 0 : i32
    %4 = tpu.memref_slice %arg2[%3, %c0_i32_1] : memref<128x128xf32, #tpu.memory_space<any>> -> memref<1x128xf32, #tpu.memory_space<any>>
    %c0_i32_2 = arith.constant 0 : i32
    %c0_i32_3 = arith.constant 0 : i32
    %5 = tpu.memref_slice %arg3[%c0_i32_2, %c0_i32_3] : memref<8x128xf32, #tpu.memory_space<vmem>> -> memref<1x128xf32, #tpu.memory_space<vmem>>
    %6 = tpu.memref_slice %arg4[%c0_i32_0] : memref<8x!tpu.dma_semaphore, #tpu.memory_space<semaphore_mem>> -> memref<1x!tpu.dma_semaphore, #tpu.memory_space<semaphore_mem>>
    %7 = tpu.memref_squeeze %6 : memref<1x!tpu.dma_semaphore, #tpu.memory_space<semaphore_mem>> -> memref<!tpu.dma_semaphore, #tpu.memory_space<semaphore_mem>>
    tpu.enqueue_dma source(%4 : memref<1x128xf32, #tpu.memory_space<any>>) target(%5 : memref<1x128xf32, #tpu.memory_space<vmem>>) target_semaphore(%7 : memref<!tpu.dma_semaphore, #tpu.memory_space<semaphore_mem>>)
    %c1_i32 = arith.constant 1 : i32
    %8 = arith.addi %0, %c1_i32 : i32
    %9 = arith.index_cast %8 : i32 to index
    %10 = memref.load %arg1[%9] : memref<16xi32, #tpu.memory_space<smem>>
    %c1_i32_4 = arith.constant 1 : i32
    %c0_i32_5 = arith.constant 0 : i32
    %11 = tpu.memref_slice %arg2[%10, %c0_i32_5] : memref<128x128xf32, #tpu.memory_space<any>> -> memref<1x128xf32, #tpu.memory_space<any>>
    %c1_i32_6 = arith.constant 1 : i32
    %c0_i32_7 = arith.constant 0 : i32
    %12 = tpu.memref_slice %arg3[%c1_i32_6, %c0_i32_7] : memref<8x128xf32, #tpu.memory_space<vmem>> -> memref<1x128xf32, #tpu.memory_space<vmem>>
    %13 = tpu.memref_slice %arg4[%c1_i32_4] : memref<8x!tpu.dma_semaphore, #tpu.memory_space<semaphore_mem>> -> memref<1x!tpu.dma_semaphore, #tpu.memory_space<semaphore_mem>>
    %14 = tpu.memref_squeeze %13 : memref<1x!tpu.dma_semaphore, #tpu.memory_space<semaphore_mem>> -> memref<!tpu.dma_semaphore, #tpu.memory_space<semaphore_mem>>
    tpu.enqueue_dma source(%11 : memref<1x128xf32, #tpu.memory_space<any>>) target(%12 : memref<1x128xf32, #tpu.memory_space<vmem>>) target_semaphore(%14 : memref<!tpu.dma_semaphore, #tpu.memory_space<semaphore_mem>>)
    %c2_i32 = arith.constant 2 : i32
    %15 = arith.addi %0, %c2_i32 : i32
    %16 = arith.index_cast %15 : i32 to index
    %17 = memref.load %arg1[%16] : memref<16xi32, #tpu.memory_space<smem>>
    %c2_i32_8 = arith.constant 2 : i32
    %c0_i32_9 = arith.constant 0 : i32
    %18 = tpu.memref_slice %arg2[%17, %c0_i32_9] : memref<128x128xf32, #tpu.memory_space<any>> -> memref<1x128xf32, #tpu.memory_space<any>>
    %c2_i32_10 = arith.constant 2 : i32
    %c0_i32_11 = arith.constant 0 : i32
    %19 = tpu.memref_slice %arg3[%c2_i32_10, %c0_i32_11] : memref<8x128xf32, #tpu.memory_space<vmem>> -> memref<1x128xf32, #tpu.memory_space<vmem>>
    %20 = tpu.memref_slice %arg4[%c2_i32_8] : memref<8x!tpu.dma_semaphore, #tpu.memory_space<semaphore_mem>> -> memref<1x!tpu.dma_semaphore, #tpu.memory_space<semaphore_mem>>
    %21 = tpu.memref_squeeze %20 : memref<1x!tpu.dma_semaphore, #tpu.memory_space<semaphore_mem>> -> memref<!tpu.dma_semaphore, #tpu.memory_space<semaphore_mem>>
    tpu.enqueue_dma source(%18 : memref<1x128xf32, #tpu.memory_space<any>>) target(%19 : memref<1x128xf32, #tpu.memory_space<vmem>>) target_semaphore(%21 : memref<!tpu.dma_semaphore, #tpu.memory_space<semaphore_mem>>)
    %c3_i32 = arith.constant 3 : i32
    %22 = arith.addi %0, %c3_i32 : i32
    %23 = arith.index_cast %22 : i32 to index
    %24 = memref.load %arg1[%23] : memref<16xi32, #tpu.memory_space<smem>>
    %c3_i32_12 = arith.constant 3 : i32
    %c0_i32_13 = arith.constant 0 : i32
    %25 = tpu.memref_slice %arg2[%24, %c0_i32_13] : memref<128x128xf32, #tpu.memory_space<any>> -> memref<1x128xf32, #tpu.memory_space<any>>
    %c3_i32_14 = arith.constant 3 : i32
    %c0_i32_15 = arith.constant 0 : i32
    %26 = tpu.memref_slice %arg3[%c3_i32_14, %c0_i32_15] : memref<8x128xf32, #tpu.memory_space<vmem>> -> memref<1x128xf32, #tpu.memory_space<vmem>>
    %27 = tpu.memref_slice %arg4[%c3_i32_12] : memref<8x!tpu.dma_semaphore, #tpu.memory_space<semaphore_mem>> -> memref<1x!tpu.dma_semaphore, #tpu.memory_space<semaphore_mem>>
    %28 = tpu.memref_squeeze %27 : memref<1x!tpu.dma_semaphore, #tpu.memory_space<semaphore_mem>> -> memref<!tpu.dma_semaphore, #tpu.memory_space<semaphore_mem>>
    tpu.enqueue_dma source(%25 : memref<1x128xf32, #tpu.memory_space<any>>) target(%26 : memref<1x128xf32, #tpu.memory_space<vmem>>) target_semaphore(%28 : memref<!tpu.dma_semaphore, #tpu.memory_space<semaphore_mem>>)
    %c4_i32 = arith.constant 4 : i32
    %29 = arith.addi %0, %c4_i32 : i32
    %30 = arith.index_cast %29 : i32 to index
    %31 = memref.load %arg1[%30] : memref<16xi32, #tpu.memory_space<smem>>
    %c4_i32_16 = arith.constant 4 : i32
    %c0_i32_17 = arith.constant 0 : i32
    %32 = tpu.memref_slice %arg2[%31, %c0_i32_17] : memref<128x128xf32, #tpu.memory_space<any>> -> memref<1x128xf32, #tpu.memory_space<any>>
    %c4_i32_18 = arith.constant 4 : i32
    %c0_i32_19 = arith.constant 0 : i32
    %33 = tpu.memref_slice %arg3[%c4_i32_18, %c0_i32_19] : memref<8x128xf32, #tpu.memory_space<vmem>> -> memref<1x128xf32, #tpu.memory_space<vmem>>
    %34 = tpu.memref_slice %arg4[%c4_i32_16] : memref<8x!tpu.dma_semaphore, #tpu.memory_space<semaphore_mem>> -> memref<1x!tpu.dma_semaphore, #tpu.memory_space<semaphore_mem>>
    %35 = tpu.memref_squeeze %34 : memref<1x!tpu.dma_semaphore, #tpu.memory_space<semaphore_mem>> -> memref<!tpu.dma_semaphore, #tpu.memory_space<semaphore_mem>>
    tpu.enqueue_dma source(%32 : memref<1x128xf32, #tpu.memory_space<any>>) target(%33 : memref<1x128xf32, #tpu.memory_space<vmem>>) target_semaphore(%35 : memref<!tpu.dma_semaphore, #tpu.memory_space<semaphore_mem>>)
    %c5_i32 = arith.constant 5 : i32
    %36 = arith.addi %0, %c5_i32 : i32
    %37 = arith.index_cast %36 : i32 to index
    %38 = memref.load %arg1[%37] : memref<16xi32, #tpu.memory_space<smem>>
    %c5_i32_20 = arith.constant 5 : i32
    %c0_i32_21 = arith.constant 0 : i32
    %39 = tpu.memref_slice %arg2[%38, %c0_i32_21] : memref<128x128xf32, #tpu.memory_space<any>> -> memref<1x128xf32, #tpu.memory_space<any>>
    %c5_i32_22 = arith.constant 5 : i32
    %c0_i32_23 = arith.constant 0 : i32
    %40 = tpu.memref_slice %arg3[%c5_i32_22, %c0_i32_23] : memref<8x128xf32, #tpu.memory_space<vmem>> -> memref<1x128xf32, #tpu.memory_space<vmem>>
    %41 = tpu.memref_slice %arg4[%c5_i32_20] : memref<8x!tpu.dma_semaphore, #tpu.memory_space<semaphore_mem>> -> memref<1x!tpu.dma_semaphore, #tpu.memory_space<semaphore_mem>>
    %42 = tpu.memref_squeeze %41 : memref<1x!tpu.dma_semaphore, #tpu.memory_space<semaphore_mem>> -> memref<!tpu.dma_semaphore, #tpu.memory_space<semaphore_mem>>
    tpu.enqueue_dma source(%39 : memref<1x128xf32, #tpu.memory_space<any>>) target(%40 : memref<1x128xf32, #tpu.memory_space<vmem>>) target_semaphore(%42 : memref<!tpu.dma_semaphore, #tpu.memory_space<semaphore_mem>>)
    %c6_i32 = arith.constant 6 : i32
    %43 = arith.addi %0, %c6_i32 : i32
    %44 = arith.index_cast %43 : i32 to index
    %45 = memref.load %arg1[%44] : memref<16xi32, #tpu.memory_space<smem>>
    %c6_i32_24 = arith.constant 6 : i32
    %c0_i32_25 = arith.constant 0 : i32
    %46 = tpu.memref_slice %arg2[%45, %c0_i32_25] : memref<128x128xf32, #tpu.memory_space<any>> -> memref<1x128xf32, #tpu.memory_space<any>>
    %c6_i32_26 = arith.constant 6 : i32
    %c0_i32_27 = arith.constant 0 : i32
    %47 = tpu.memref_slice %arg3[%c6_i32_26, %c0_i32_27] : memref<8x128xf32, #tpu.memory_space<vmem>> -> memref<1x128xf32, #tpu.memory_space<vmem>>
    %48 = tpu.memref_slice %arg4[%c6_i32_24] : memref<8x!tpu.dma_semaphore, #tpu.memory_space<semaphore_mem>> -> memref<1x!tpu.dma_semaphore, #tpu.memory_space<semaphore_mem>>
    %49 = tpu.memref_squeeze %48 : memref<1x!tpu.dma_semaphore, #tpu.memory_space<semaphore_mem>> -> memref<!tpu.dma_semaphore, #tpu.memory_space<semaphore_mem>>
    tpu.enqueue_dma source(%46 : memref<1x128xf32, #tpu.memory_space<any>>) target(%47 : memref<1x128xf32, #tpu.memory_space<vmem>>) target_semaphore(%49 : memref<!tpu.dma_semaphore, #tpu.memory_space<semaphore_mem>>)
    %c7_i32 = arith.constant 7 : i32
    %50 = arith.addi %0, %c7_i32 : i32
    %51 = arith.index_cast %50 : i32 to index
    %52 = memref.load %arg1[%51] : memref<16xi32, #tpu.memory_space<smem>>
    %c7_i32_28 = arith.constant 7 : i32
    %c0_i32_29 = arith.constant 0 : i32
    %53 = tpu.memref_slice %arg2[%52, %c0_i32_29] : memref<128x128xf32, #tpu.memory_space<any>> -> memref<1x128xf32, #tpu.memory_space<any>>
    %c7_i32_30 = arith.constant 7 : i32
    %c0_i32_31 = arith.constant 0 : i32
    %54 = tpu.memref_slice %arg3[%c7_i32_30, %c0_i32_31] : memref<8x128xf32, #tpu.memory_space<vmem>> -> memref<1x128xf32, #tpu.memory_space<vmem>>
    %55 = tpu.memref_slice %arg4[%c7_i32_28] : memref<8x!tpu.dma_semaphore, #tpu.memory_space<semaphore_mem>> -> memref<1x!tpu.dma_semaphore, #tpu.memory_space<semaphore_mem>>
    %56 = tpu.memref_squeeze %55 : memref<1x!tpu.dma_semaphore, #tpu.memory_space<semaphore_mem>> -> memref<!tpu.dma_semaphore, #tpu.memory_space<semaphore_mem>>
    tpu.enqueue_dma source(%53 : memref<1x128xf32, #tpu.memory_space<any>>) target(%54 : memref<1x128xf32, #tpu.memory_space<vmem>>) target_semaphore(%56 : memref<!tpu.dma_semaphore, #tpu.memory_space<semaphore_mem>>)
    %c0_i32_32 = arith.constant 0 : i32
    %57 = arith.addi %0, %c0_i32_32 : i32
    %58 = arith.index_cast %57 : i32 to index
    %59 = memref.load %arg1[%58] : memref<16xi32, #tpu.memory_space<smem>>
    %c0_i32_33 = arith.constant 0 : i32
    %c0_i32_34 = arith.constant 0 : i32
    %60 = tpu.memref_slice %arg2[%59, %c0_i32_34] : memref<128x128xf32, #tpu.memory_space<any>> -> memref<1x128xf32, #tpu.memory_space<any>>
    %c0_i32_35 = arith.constant 0 : i32
    %c0_i32_36 = arith.constant 0 : i32
    %61 = tpu.memref_slice %arg3[%c0_i32_35, %c0_i32_36] : memref<8x128xf32, #tpu.memory_space<vmem>> -> memref<1x128xf32, #tpu.memory_space<vmem>>
    %62 = tpu.memref_slice %arg4[%c0_i32_33] : memref<8x!tpu.dma_semaphore, #tpu.memory_space<semaphore_mem>> -> memref<1x!tpu.dma_semaphore, #tpu.memory_space<semaphore_mem>>
    %63 = tpu.memref_squeeze %62 : memref<1x!tpu.dma_semaphore, #tpu.memory_space<semaphore_mem>> -> memref<!tpu.dma_semaphore, #tpu.memory_space<semaphore_mem>>
    tpu.wait_dma2 semaphore(%63 : memref<!tpu.dma_semaphore, #tpu.memory_space<semaphore_mem>>) src(%60 : memref<1x128xf32, #tpu.memory_space<any>>) dst(%61 : memref<1x128xf32, #tpu.memory_space<vmem>>)
    %c1_i32_37 = arith.constant 1 : i32
    %64 = arith.addi %0, %c1_i32_37 : i32
    %65 = arith.index_cast %64 : i32 to index
    %66 = memref.load %arg1[%65] : memref<16xi32, #tpu.memory_space<smem>>
    %c1_i32_38 = arith.constant 1 : i32
    %c0_i32_39 = arith.constant 0 : i32
    %67 = tpu.memref_slice %arg2[%66, %c0_i32_39] : memref<128x128xf32, #tpu.memory_space<any>> -> memref<1x128xf32, #tpu.memory_space<any>>
    %c1_i32_40 = arith.constant 1 : i32
    %c0_i32_41 = arith.constant 0 : i32
    %68 = tpu.memref_slice %arg3[%c1_i32_40, %c0_i32_41] : memref<8x128xf32, #tpu.memory_space<vmem>> -> memref<1x128xf32, #tpu.memory_space<vmem>>
    %69 = tpu.memref_slice %arg4[%c1_i32_38] : memref<8x!tpu.dma_semaphore, #tpu.memory_space<semaphore_mem>> -> memref<1x!tpu.dma_semaphore, #tpu.memory_space<semaphore_mem>>
    %70 = tpu.memref_squeeze %69 : memref<1x!tpu.dma_semaphore, #tpu.memory_space<semaphore_mem>> -> memref<!tpu.dma_semaphore, #tpu.memory_space<semaphore_mem>>
    tpu.wait_dma2 semaphore(%70 : memref<!tpu.dma_semaphore, #tpu.memory_space<semaphore_mem>>) src(%67 : memref<1x128xf32, #tpu.memory_space<any>>) dst(%68 : memref<1x128xf32, #tpu.memory_space<vmem>>)
    %c2_i32_42 = arith.constant 2 : i32
    %71 = arith.addi %0, %c2_i32_42 : i32
    %72 = arith.index_cast %71 : i32 to index
    %73 = memref.load %arg1[%72] : memref<16xi32, #tpu.memory_space<smem>>
    %c2_i32_43 = arith.constant 2 : i32
    %c0_i32_44 = arith.constant 0 : i32
    %74 = tpu.memref_slice %arg2[%73, %c0_i32_44] : memref<128x128xf32, #tpu.memory_space<any>> -> memref<1x128xf32, #tpu.memory_space<any>>
    %c2_i32_45 = arith.constant 2 : i32
    %c0_i32_46 = arith.constant 0 : i32
    %75 = tpu.memref_slice %arg3[%c2_i32_45, %c0_i32_46] : memref<8x128xf32, #tpu.memory_space<vmem>> -> memref<1x128xf32, #tpu.memory_space<vmem>>
    %76 = tpu.memref_slice %arg4[%c2_i32_43] : memref<8x!tpu.dma_semaphore, #tpu.memory_space<semaphore_mem>> -> memref<1x!tpu.dma_semaphore, #tpu.memory_space<semaphore_mem>>
    %77 = tpu.memref_squeeze %76 : memref<1x!tpu.dma_semaphore, #tpu.memory_space<semaphore_mem>> -> memref<!tpu.dma_semaphore, #tpu.memory_space<semaphore_mem>>
    tpu.wait_dma2 semaphore(%77 : memref<!tpu.dma_semaphore, #tpu.memory_space<semaphore_mem>>) src(%74 : memref<1x128xf32, #tpu.memory_space<any>>) dst(%75 : memref<1x128xf32, #tpu.memory_space<vmem>>)
    %c3_i32_47 = arith.constant 3 : i32
    %78 = arith.addi %0, %c3_i32_47 : i32
    %79 = arith.index_cast %78 : i32 to index
    %80 = memref.load %arg1[%79] : memref<16xi32, #tpu.memory_space<smem>>
    %c3_i32_48 = arith.constant 3 : i32
    %c0_i32_49 = arith.constant 0 : i32
    %81 = tpu.memref_slice %arg2[%80, %c0_i32_49] : memref<128x128xf32, #tpu.memory_space<any>> -> memref<1x128xf32, #tpu.memory_space<any>>
    %c3_i32_50 = arith.constant 3 : i32
    %c0_i32_51 = arith.constant 0 : i32
    %82 = tpu.memref_slice %arg3[%c3_i32_50, %c0_i32_51] : memref<8x128xf32, #tpu.memory_space<vmem>> -> memref<1x128xf32, #tpu.memory_space<vmem>>
    %83 = tpu.memref_slice %arg4[%c3_i32_48] : memref<8x!tpu.dma_semaphore, #tpu.memory_space<semaphore_mem>> -> memref<1x!tpu.dma_semaphore, #tpu.memory_space<semaphore_mem>>
    %84 = tpu.memref_squeeze %83 : memref<1x!tpu.dma_semaphore, #tpu.memory_space<semaphore_mem>> -> memref<!tpu.dma_semaphore, #tpu.memory_space<semaphore_mem>>
    tpu.wait_dma2 semaphore(%84 : memref<!tpu.dma_semaphore, #tpu.memory_space<semaphore_mem>>) src(%81 : memref<1x128xf32, #tpu.memory_space<any>>) dst(%82 : memref<1x128xf32, #tpu.memory_space<vmem>>)
    %c4_i32_52 = arith.constant 4 : i32
    %85 = arith.addi %0, %c4_i32_52 : i32
    %86 = arith.index_cast %85 : i32 to index
    %87 = memref.load %arg1[%86] : memref<16xi32, #tpu.memory_space<smem>>
    %c4_i32_53 = arith.constant 4 : i32
    %c0_i32_54 = arith.constant 0 : i32
    %88 = tpu.memref_slice %arg2[%87, %c0_i32_54] : memref<128x128xf32, #tpu.memory_space<any>> -> memref<1x128xf32, #tpu.memory_space<any>>
    %c4_i32_55 = arith.constant 4 : i32
    %c0_i32_56 = arith.constant 0 : i32
    %89 = tpu.memref_slice %arg3[%c4_i32_55, %c0_i32_56] : memref<8x128xf32, #tpu.memory_space<vmem>> -> memref<1x128xf32, #tpu.memory_space<vmem>>
    %90 = tpu.memref_slice %arg4[%c4_i32_53] : memref<8x!tpu.dma_semaphore, #tpu.memory_space<semaphore_mem>> -> memref<1x!tpu.dma_semaphore, #tpu.memory_space<semaphore_mem>>
    %91 = tpu.memref_squeeze %90 : memref<1x!tpu.dma_semaphore, #tpu.memory_space<semaphore_mem>> -> memref<!tpu.dma_semaphore, #tpu.memory_space<semaphore_mem>>
    tpu.wait_dma2 semaphore(%91 : memref<!tpu.dma_semaphore, #tpu.memory_space<semaphore_mem>>) src(%88 : memref<1x128xf32, #tpu.memory_space<any>>) dst(%89 : memref<1x128xf32, #tpu.memory_space<vmem>>)
    %c5_i32_57 = arith.constant 5 : i32
    %92 = arith.addi %0, %c5_i32_57 : i32
    %93 = arith.index_cast %92 : i32 to index
    %94 = memref.load %arg1[%93] : memref<16xi32, #tpu.memory_space<smem>>
    %c5_i32_58 = arith.constant 5 : i32
    %c0_i32_59 = arith.constant 0 : i32
    %95 = tpu.memref_slice %arg2[%94, %c0_i32_59] : memref<128x128xf32, #tpu.memory_space<any>> -> memref<1x128xf32, #tpu.memory_space<any>>
    %c5_i32_60 = arith.constant 5 : i32
    %c0_i32_61 = arith.constant 0 : i32
    %96 = tpu.memref_slice %arg3[%c5_i32_60, %c0_i32_61] : memref<8x128xf32, #tpu.memory_space<vmem>> -> memref<1x128xf32, #tpu.memory_space<vmem>>
    %97 = tpu.memref_slice %arg4[%c5_i32_58] : memref<8x!tpu.dma_semaphore, #tpu.memory_space<semaphore_mem>> -> memref<1x!tpu.dma_semaphore, #tpu.memory_space<semaphore_mem>>
    %98 = tpu.memref_squeeze %97 : memref<1x!tpu.dma_semaphore, #tpu.memory_space<semaphore_mem>> -> memref<!tpu.dma_semaphore, #tpu.memory_space<semaphore_mem>>
    tpu.wait_dma2 semaphore(%98 : memref<!tpu.dma_semaphore, #tpu.memory_space<semaphore_mem>>) src(%95 : memref<1x128xf32, #tpu.memory_space<any>>) dst(%96 : memref<1x128xf32, #tpu.memory_space<vmem>>)
    %c6_i32_62 = arith.constant 6 : i32
    %99 = arith.addi %0, %c6_i32_62 : i32
    %100 = arith.index_cast %99 : i32 to index
    %101 = memref.load %arg1[%100] : memref<16xi32, #tpu.memory_space<smem>>
    %c6_i32_63 = arith.constant 6 : i32
    %c0_i32_64 = arith.constant 0 : i32
    %102 = tpu.memref_slice %arg2[%101, %c0_i32_64] : memref<128x128xf32, #tpu.memory_space<any>> -> memref<1x128xf32, #tpu.memory_space<any>>
    %c6_i32_65 = arith.constant 6 : i32
    %c0_i32_66 = arith.constant 0 : i32
    %103 = tpu.memref_slice %arg3[%c6_i32_65, %c0_i32_66] : memref<8x128xf32, #tpu.memory_space<vmem>> -> memref<1x128xf32, #tpu.memory_space<vmem>>
    %104 = tpu.memref_slice %arg4[%c6_i32_63] : memref<8x!tpu.dma_semaphore, #tpu.memory_space<semaphore_mem>> -> memref<1x!tpu.dma_semaphore, #tpu.memory_space<semaphore_mem>>
    %105 = tpu.memref_squeeze %104 : memref<1x!tpu.dma_semaphore, #tpu.memory_space<semaphore_mem>> -> memref<!tpu.dma_semaphore, #tpu.memory_space<semaphore_mem>>
    tpu.wait_dma2 semaphore(%105 : memref<!tpu.dma_semaphore, #tpu.memory_space<semaphore_mem>>) src(%102 : memref<1x128xf32, #tpu.memory_space<any>>) dst(%103 : memref<1x128xf32, #tpu.memory_space<vmem>>)
    %c7_i32_67 = arith.constant 7 : i32
    %106 = arith.addi %0, %c7_i32_67 : i32
    %107 = arith.index_cast %106 : i32 to index
    %108 = memref.load %arg1[%107] : memref<16xi32, #tpu.memory_space<smem>>
    %c7_i32_68 = arith.constant 7 : i32
    %c0_i32_69 = arith.constant 0 : i32
    %109 = tpu.memref_slice %arg2[%108, %c0_i32_69] : memref<128x128xf32, #tpu.memory_space<any>> -> memref<1x128xf32, #tpu.memory_space<any>>
    %c7_i32_70 = arith.constant 7 : i32
    %c0_i32_71 = arith.constant 0 : i32
    %110 = tpu.memref_slice %arg3[%c7_i32_70, %c0_i32_71] : memref<8x128xf32, #tpu.memory_space<vmem>> -> memref<1x128xf32, #tpu.memory_space<vmem>>
    %111 = tpu.memref_slice %arg4[%c7_i32_68] : memref<8x!tpu.dma_semaphore, #tpu.memory_space<semaphore_mem>> -> memref<1x!tpu.dma_semaphore, #tpu.memory_space<semaphore_mem>>
    %112 = tpu.memref_squeeze %111 : memref<1x!tpu.dma_semaphore, #tpu.memory_space<semaphore_mem>> -> memref<!tpu.dma_semaphore, #tpu.memory_space<semaphore_mem>>
    tpu.wait_dma2 semaphore(%112 : memref<!tpu.dma_semaphore, #tpu.memory_space<semaphore_mem>>) src(%109 : memref<1x128xf32, #tpu.memory_space<any>>) dst(%110 : memref<1x128xf32, #tpu.memory_space<vmem>>)
    %c0 = arith.constant 0 : index
    %c0_72 = arith.constant 0 : index
    %113 = vector.load %arg3[%c0, %c0_72] : memref<8x128xf32, #tpu.memory_space<vmem>>, vector<8x128xf32>
    %cst = arith.constant 5.65685415 : f32
    %114 = vector.broadcast %cst : f32 to vector<8x128xf32>
    %115 = arith.mulf %113, %114 : vector<8x128xf32>
    %c0_73 = arith.constant 0 : index
    %c0_74 = arith.constant 0 : index
    %116 = vector.load %arg3[%c0_73, %c0_74] : memref<8x128xf32, #tpu.memory_space<vmem>>, vector<8x128xf32>
    tpu.vector_store %arg3[%c0_73, %c0_74], %115 {strides = array<i32>} : memref<8x128xf32, #tpu.memory_space<vmem>>, vector<8x128xf32>,
    return
  }
  func.func @transform_1(%arg0: i32, %arg1: memref<16xi32, #tpu.memory_space<smem>>) -> (i32, i32) {
    %c0_i32 = arith.constant 0 : i32
    %c0_i32_0 = arith.constant 0 : i32
    return %arg0, %c0_i32 : i32, i32
  }
}

</mosaic_0001>

<bundles_post_ra>
// kernel: tpu_custom_call.1
= control target key start
LH: loop header
LB: loop body
LE: loop exit
PB: predicated region body
PF: predicated region fallthrough
CT: control target
= control target key end

     0   :  { %s927_s0 = inlined_call_operand.hbm [shape: s32[16], index: 0, kind: input, shape index: {}]   ;;  %s928_s1 = inlined_call_operand.hbm [shape: f32[128,128], index: 1, kind: input, shape index: {}]   ;;  %s929_s2 = inlined_call_operand.hbm [shape: f32[16,128], index: 2, kind: output, shape index: {}]  }
   0x1   :  { %s399_s11 = scalar_lea.hbm %s927_s0, 16 }
   0x2   :  { %p400_p0 = scmp.ne.s32.totalorder %s927_s0, %s399_s11  ;;  %p403_p1 = scmp.lt.u32.totalorder %s399_s11, %s927_s0 }
   0x4   :  { %p405_p2 = pnand %p403_p1, %p400_p0 }
   0x6   :  { %408 = shalt.err (!%p405_p2)  }
   0x7   :  { %s675_s16 = smov [#allocation4]  }
   0x8   :  { %8 = dma.hbm_to_smem %s927_s0, 16, %s675_s16, [#allocation3] }
   0x9   :  { %641 = dma.done.wait [#allocation3], 16 }
   0xa   :  { %642 = vsyncadd [#allocation3], 4294967280 }
   0xb   :  { %10 = sfence }
   0xc   :  { %11 = vsyncpa [#allocation6], 0 }
   0xd   :  { %13 = vsyncpa [#allocation6 + $0x1], 0  ;;  %s704_s19 = smov 0   ;;  %s706_s20 = smov 0  }
   0xe   :  { %s708_s21 = smov 0  }
   0xf LB: > { %s342_s0 = sadd.s32 4294967295, %s673_s21   ;;  %s721_s22 = sadd.s32 1, %s673_s21   ;;  %s673_s21 = sphi %s708_s21, %s940_s21   ;;  %s669_s20 = sphi %s706_s20, %s939_s20   ;;  %s665_s19 = sphi %s704_s19, %s938_s19  }
  0x10   : > { %s22_s23 = ssub.s32 %s673_s21, %s721_s22  ;;  %s25_s24 = sadd.s32 1, %s669_s20 }
  0x11   : > { %p23_p3 = scmp.eq.s32.totalorder %s22_s23, 0  ;;  %p343_p4 = scmp.ne.s32.totalorder %s22_s23, 0 }
  0x12   : > { %p29_p5 = scmp.eq.s32.totalorder %s673_s21, 1  ;;  %p34_p6 = scmp.ne.s32.totalorder %s669_s20, %s665_s19 }
  0x13   : > { %s730_s25 = scalar_select %p23_p3, %s669_s20, %s25_s24  }
  0x14   : > { %p732_p7 = por %p343_p4, %p29_p5  ;;  %p35_p8 = scmp.eq.s32.totalorder %s342_s0, 1 }
  0x15   : > { %932 = sst [smem:[#allocation35_spill]] %s730_s25  ;;  %p344_p10 = scmp.ge.s32.totalorder %s673_s21, 2 }
  0x16   : > { %p736_p9 = por %p35_p8, %p34_p6  ;;  %s931_s28 = sand.u32 (!%p344_p10), 1, %s669_s20  }
  0x17   : > { %44 = sbr.rel (%p344_p10) target bundleno = 245 (0xf5), region = 12  ;;  %s743_s29 = sshll.u32 (!%p344_p10), %s673_s21, 3 }
  0x18   : > { %s345_s30 = sshll.u32 (!%p344_p10), %s931_s28, 3  ;;  %s53_s3 = sld [smem:[#allocation4 + %s743_s29]] (!%p344_p10) }
  0x19   : > { %s67_s4 = sadd.s32 (!%p344_p10), 1, %s743_s29  ;;  %s749_s5 = scalar_lea.vmem (!%p344_p10), [#allocation5], %s345_s30 }
  0x1a   : > { %s63_s6 = sshll.u32 (!%p344_p10), %s749_s5, 4  ;;  %s752_s7 = sld [smem:[#allocation4 + %s67_s4]] (!%p344_p10)  ;;  %s754_s6 = int_to_ptr.vmem [resolvable:$true] %s63_s6 }
  0x1b   : > { %s71_s8 = scalar_lea.vmem (!%p344_p10), %s749_s5, 1 [#allocation5]  ;;  %s84_s10 = sadd.s32 (!%p344_p10), 2, %s743_s29 }
  0x1c   : > { %s80_s9 = sshll.u32 (!%p344_p10), %s71_s8, 4  ;;  %s760_s11 = sld [smem:[#allocation4 + %s84_s10]] (!%p344_p10)  ;;  %s758_s9 = int_to_ptr.vmem [resolvable:$true] %s80_s9 }
  0x1d   : > { %s88_s13 = scalar_lea.vmem (!%p344_p10), %s749_s5, 2 [#allocation5]  ;;  %s769_s24 = scalar_lea.hbm (!%p344_p10), %s928_s1, 2048 }
  0x1e   : > { %s347_s12 = sshll.u32 %s53_s3, 4  ;;  %s97_s17 = sshll.u32 %s88_s13, 4  ;;  %s790_s17 = int_to_ptr.vmem [resolvable:$true] %s97_s17 }
  0x1f   : > { %s55_s16 = scalar_lea.hbm %s928_s1, %s347_s12 }
  0x20   : > { %s409_s18 = scalar_lea.hbm %s55_s16, 16  ;;  %p412_p12 = scmp.lt.u32.totalorder %s55_s16, %s928_s1 }
  0x21   : > { %p410_p11 = scmp.ne.s32.totalorder %s55_s16, %s409_s18  ;;  %p413_p13 = scmp.lt.u32.totalorder %s769_s24, %s409_s18 }
  0x22   : > { %p415_p1 = scmp.lt.u32.totalorder %s409_s18, %s55_s16 }
  0x23   : > { %p414_p0 = por %p413_p13, %p412_p12 }
  0x25   : > { %p416_p2 = por %p415_p1, %p414_p0 }
  0x27   : > { %p417_p3 = pnand %p416_p2, %p410_p11 }
  0x29   : > { %420 = shalt.err (!%p417_p3)  }
  0x2a   : > { %s421_s3 = scalar_lea.vmem %s754_s6, 16  ;;  %s676_s8 = smov [#allocation5]  }
  0x2b   : > { %p422_p4 = scmp.ne.s32.totalorder %s754_s6, %s421_s3  ;;  %s423_s10 = sshll.u32 %s676_s8, 4  ;;  %s777_s10 = int_to_ptr.vmem [resolvable:$false] %s423_s10 }
  0x2c   : > { %s780_s12 = scalar_lea.vmem %s777_s10, 256  ;;  %p930_p5 = scmp.lt.s32.totalorder %s754_s6, %s777_s10 }
  0x2d   : > { %p427_p6 = scmp.lt.s32.totalorder %s780_s12, %s421_s3 }
  0x2f   : > { %p428_p8 = por %p427_p6, %p930_p5 }
  0x31   : > { %p429_p10 = pnand %p428_p8, %p422_p4 }
  0x33   : > { %432 = shalt.err (!%p429_p10)  }
  0x34   : > { %66 = dma.hbm_to_vmem [thread:$0]  %s55_s16, 16, %s754_s6, [#allocation2] }
  0x35   : > { %s348_s13 = sshll.u32 %s752_s7, 4  ;;  %s101_s0 = sadd.s32 3, %s743_s29 }
  0x36   : > { %s70_s18 = scalar_lea.hbm %s928_s1, %s348_s13 }
  0x37   : > { %s433_s23 = scalar_lea.hbm %s70_s18, 16  ;;  %p436_p12 = scmp.lt.u32.totalorder %s70_s18, %s928_s1 }
  0x38   : > { %p434_p11 = scmp.ne.s32.totalorder %s70_s18, %s433_s23  ;;  %p437_p13 = scmp.lt.u32.totalorder %s769_s24, %s433_s23 }
  0x39   : > { %p439_p1 = scmp.lt.u32.totalorder %s433_s23, %s70_s18 }
  0x3a   : > { %p438_p0 = por %p437_p13, %p436_p12 }
  0x3c   : > { %p440_p2 = por %p439_p1, %p438_p0 }
  0x3e   : > { %p441_p3 = pnand %p440_p2, %p434_p11 }
  0x40   : > { %444 = shalt.err (!%p441_p3)  }
  0x41   : > { %s445_s7 = scalar_lea.vmem %s758_s9, 16  ;;  %p450_p6 = scmp.lt.s32.totalorder %s758_s9, %s777_s10 }
  0x42   : > { %p446_p4 = scmp.ne.s32.totalorder %s758_s9, %s445_s7  ;;  %p451_p8 = scmp.lt.s32.totalorder %s780_s12, %s445_s7 }
  0x44   : > { %p452_p10 = por %p451_p8, %p450_p6 }
  0x46   : > { %p453_p5 = pnand %p452_p10, %p446_p4 }
  0x48   : > { %456 = shalt.err (!%p453_p5)  }
  0x49   : > { %83 = dma.hbm_to_vmem [thread:$0]  %s70_s18, 16, %s758_s9, [#allocation2 + $0x1] }
  0x4a   : > { %s349_s16 = sshll.u32 %s760_s11, 4  ;;  %s807_s3 = sld [smem:[#allocation4 + %s101_s0]] }
  0x4b   : > { %s87_s14 = scalar_lea.hbm %s928_s1, %s349_s16  ;;  %s105_s15 = scalar_lea.vmem %s749_s5, 3 [#allocation5] }
  0x4c   : > { %s457_s23 = scalar_lea.hbm %s87_s14, 16  ;;  %p460_p12 = scmp.lt.u32.totalorder %s87_s14, %s928_s1 }
  0x4d   : > { %p458_p11 = scmp.ne.s32.totalorder %s87_s14, %s457_s23  ;;  %p461_p5 = scmp.lt.u32.totalorder %s769_s24, %s457_s23 }
  0x4e   : > { %p463_p0 = scmp.lt.u32.totalorder %s457_s23, %s87_s14 }
  0x4f   : > { %p462_p13 = por %p461_p5, %p460_p12 }
  0x51   : > { %p464_p1 = por %p463_p0, %p462_p13 }
  0x53   : > { %p465_p2 = pnand %p464_p1, %p458_p11 }
  0x55   : > { %468 = shalt.err (!%p465_p2)  }
  0x56   : > { %s469_s9 = scalar_lea.vmem %s790_s17, 16  ;;  %p474_p4 = scmp.lt.s32.totalorder %s790_s17, %s777_s10 }
  0x57   : > { %p470_p3 = scmp.ne.s32.totalorder %s790_s17, %s469_s9  ;;  %p475_p6 = scmp.lt.s32.totalorder %s780_s12, %s469_s9 }
  0x59   : > { %p476_p8 = por %p475_p6, %p474_p4 }
  0x5b   : > { %p477_p10 = pnand %p476_p8, %p470_p3 }
  0x5d   : > { %480 = shalt.err (!%p477_p10)  }
  0x5e   : > { %100 = dma.hbm_to_vmem [thread:$0]  %s87_s14, 16, %s790_s17, [#allocation2 + $0x2] }
  0x5f   : > { %s114_s11 = sshll.u32 %s105_s15, 4  ;;  %s118_s18 = sadd.s32 4, %s743_s29  ;;  %s115_s11 = int_to_ptr.vmem [resolvable:$true] %s114_s11 }
  0x60   : > { %s119_s0 = sld [smem:[#allocation4 + %s118_s18]]  ;;  %s122_s7 = scalar_lea.vmem %s749_s5, 4 [#allocation5] }
  0x61   : > { %s135_s16 = sadd.s32 5, %s743_s29  ;;  %s350_s8 = sshll.u32 %s807_s3, 4 }
  0x62   : > { %s131_s13 = sshll.u32 %s122_s7, 4  ;;  %s104_s4 = scalar_lea.hbm %s928_s1, %s350_s8  ;;  %s830_s13 = int_to_ptr.vmem [resolvable:$true] %s131_s13 }
  0x63   : > { %s481_s9 = scalar_lea.hbm %s104_s4, 16  ;;  %p484_p12 = scmp.lt.u32.totalorder %s104_s4, %s928_s1 }
  0x64   : > { %p482_p11 = scmp.ne.s32.totalorder %s104_s4, %s481_s9  ;;  %p485_p5 = scmp.lt.u32.totalorder %s769_s24, %s481_s9 }
  0x65   : > { %p487_p0 = scmp.lt.u32.totalorder %s481_s9, %s104_s4 }
  0x66   : > { %p486_p13 = por %p485_p5, %p484_p12 }
  0x68   : > { %p488_p1 = por %p487_p0, %p486_p13 }
  0x6a   : > { %p489_p2 = pnand %p488_p1, %p482_p11 }
  0x6c   : > { %492 = shalt.err (!%p489_p2)  }
  0x6d   : > { %s493_s17 = scalar_lea.vmem %s115_s11, 16  ;;  %p498_p4 = scmp.lt.s32.totalorder %s115_s11, %s777_s10 }
  0x6e   : > { %p494_p3 = scmp.ne.s32.totalorder %s115_s11, %s493_s17  ;;  %p499_p6 = scmp.lt.s32.totalorder %s780_s12, %s493_s17 }
  0x70   : > { %p500_p8 = por %p499_p6, %p498_p4 }
  0x72   : > { %p501_p10 = pnand %p500_p8, %p494_p3 }
  0x74   : > { %504 = shalt.err (!%p501_p10)  }
  0x75   : > { %117 = dma.hbm_to_vmem [thread:$0]  %s104_s4, 16, %s115_s11, [#allocation2 + $0x3] }
  0x76   : > { %s838_s25 = sld [smem:[#allocation4 + %s135_s16]]  ;;  %s139_s28 = scalar_lea.vmem %s749_s5, 5 [#allocation5] }
  0x77   : > { %s351_s3 = sshll.u32 %s119_s0, 4  ;;  %s148_s7 = sshll.u32 %s139_s28, 4  ;;  %s149_s7 = int_to_ptr.vmem [resolvable:$true] %s148_s7 }
  0x78   : > { %s121_s18 = scalar_lea.hbm %s928_s1, %s351_s3 }
  0x79   : > { %s505_s8 = scalar_lea.hbm %s121_s18, 16  ;;  %p508_p12 = scmp.lt.u32.totalorder %s121_s18, %s928_s1 }
  0x7a   : > { %p506_p11 = scmp.ne.s32.totalorder %s121_s18, %s505_s8  ;;  %p509_p5 = scmp.lt.u32.totalorder %s769_s24, %s505_s8 }
  0x7b   : > { %p511_p0 = scmp.lt.u32.totalorder %s505_s8, %s121_s18 }
  0x7c   : > { %p510_p13 = por %p509_p5, %p508_p12 }
  0x7e   : > { %p512_p1 = por %p511_p0, %p510_p13 }
  0x80   : > { %p513_p2 = pnand %p512_p1, %p506_p11 }
  0x82   : > { %516 = shalt.err (!%p513_p2)  }
  0x83   : > { %s517_s11 = scalar_lea.vmem %s830_s13, 16  ;;  %p522_p4 = scmp.lt.s32.totalorder %s830_s13, %s777_s10 }
  0x84   : > { %p518_p3 = scmp.ne.s32.totalorder %s830_s13, %s517_s11  ;;  %p523_p6 = scmp.lt.s32.totalorder %s780_s12, %s517_s11 }
  0x86   : > { %p524_p8 = por %p523_p6, %p522_p4 }
  0x88   : > { %p525_p10 = pnand %p524_p8, %p518_p3 }
  0x8a   : > { %528 = shalt.err (!%p525_p10)  }
  0x8b   : > { %134 = dma.hbm_to_vmem [thread:$0]  %s121_s18, 16, %s830_s13, [#allocation2 + $0x4] }
  0x8c   : > { %s152_s0 = sadd.s32 6, %s743_s29  ;;  %s156_s16 = scalar_lea.vmem %s749_s5, 6 [#allocation5] }
  0x8d   : > { %s153_s4 = sld [smem:[#allocation4 + %s152_s0]]  ;;  %s352_s9 = sshll.u32 %s838_s25, 4 }
  0x8e   : > { %s165_s17 = sshll.u32 %s156_s16, 4  ;;  %s138_s14 = scalar_lea.hbm %s928_s1, %s352_s9  ;;  %s166_s17 = int_to_ptr.vmem [resolvable:$true] %s165_s17 }
  0x8f   : > { %s169_s15 = sadd.s32 7, %s743_s29  ;;  %s529_s8 = scalar_lea.hbm %s138_s14, 16 }
  0x90   : > { %p530_p11 = scmp.ne.s32.totalorder %s138_s14, %s529_s8  ;;  %p532_p12 = scmp.lt.u32.totalorder %s138_s14, %s928_s1 }
  0x91   : > { %p533_p5 = scmp.lt.u32.totalorder %s769_s24, %s529_s8  ;;  %p535_p0 = scmp.lt.u32.totalorder %s529_s8, %s138_s14 }
  0x93   : > { %p534_p13 = por %p533_p5, %p532_p12 }
  0x95   : > { %p536_p1 = por %p535_p0, %p534_p13 }
  0x97   : > { %p537_p2 = pnand %p536_p1, %p530_p11 }
  0x99   : > { %540 = shalt.err (!%p537_p2)  }
  0x9a   : > { %s541_s13 = scalar_lea.vmem %s149_s7, 16  ;;  %p546_p4 = scmp.lt.s32.totalorder %s149_s7, %s777_s10 }
  0x9b   : > { %p542_p3 = scmp.ne.s32.totalorder %s149_s7, %s541_s13  ;;  %p547_p6 = scmp.lt.s32.totalorder %s780_s12, %s541_s13 }
  0x9d   : > { %p548_p8 = por %p547_p6, %p546_p4 }
  0x9f   : > { %p549_p10 = pnand %p548_p8, %p542_p3 }
  0xa1   : > { %552 = shalt.err (!%p549_p10)  }
  0xa2   : > { %151 = dma.hbm_to_vmem [thread:$0]  %s138_s14, 16, %s149_s7, [#allocation2 + $0x5] }
  0xa3   : > { %s170_s29 = sld [smem:[#allocation4 + %s169_s15]]  ;;  %s173_s25 = scalar_lea.vmem %s749_s5, 7 [#allocation5] }
  0xa4   : > { %s353_s18 = sshll.u32 %s153_s4, 4  ;;  %s182_s11 = sshll.u32 %s173_s25, 4  ;;  %s183_s11 = int_to_ptr.vmem [resolvable:$true] %s182_s11 }
  0xa5   : > { %s155_s9 = scalar_lea.hbm %s928_s1, %s353_s18 }
  0xa6   : > { %s553_s28 = scalar_lea.hbm %s155_s9, 16  ;;  %p556_p12 = scmp.lt.u32.totalorder %s155_s9, %s928_s1 }
  0xa7   : > { %p554_p11 = scmp.ne.s32.totalorder %s155_s9, %s553_s28  ;;  %p557_p5 = scmp.lt.u32.totalorder %s769_s24, %s553_s28 }
  0xa8   : > { %p559_p0 = scmp.lt.u32.totalorder %s553_s28, %s155_s9 }
  0xa9   : > { %p558_p13 = por %p557_p5, %p556_p12 }
  0xab   : > { %p560_p1 = por %p559_p0, %p558_p13 }
  0xad   : > { %p561_p2 = pnand %p560_p1, %p554_p11 }
  0xaf   : > { %564 = shalt.err (!%p561_p2)  }
  0xb0   : > { %s565_s7 = scalar_lea.vmem %s166_s17, 16  ;;  %p570_p4 = scmp.lt.s32.totalorder %s166_s17, %s777_s10 }
  0xb1   : > { %p566_p3 = scmp.ne.s32.totalorder %s166_s17, %s565_s7  ;;  %p571_p6 = scmp.lt.s32.totalorder %s780_s12, %s565_s7 }
  0xb3   : > { %p572_p8 = por %p571_p6, %p570_p4 }
  0xb5   : > { %p573_p10 = pnand %p572_p8, %p566_p3 }
  0xb7   : > { %576 = shalt.err (!%p573_p10)  }
  0xb8   : > { %168 = dma.hbm_to_vmem [thread:$0]  %s155_s9, 16, %s166_s17, [#allocation2 + $0x6] }
  0xb9   : > { %s354_s4 = sshll.u32 %s170_s29, 4 }
  0xba   : > { %s172_s23 = scalar_lea.hbm %s928_s1, %s354_s4 }
  0xbb   : > { %s577_s30 = scalar_lea.hbm %s172_s23, 16  ;;  %p580_p12 = scmp.lt.u32.totalorder %s172_s23, %s928_s1 }
  0xbc   : > { %p578_p11 = scmp.ne.s32.totalorder %s172_s23, %s577_s30  ;;  %p581_p5 = scmp.lt.u32.totalorder %s769_s24, %s577_s30 }
  0xbd   : > { %p583_p0 = scmp.lt.u32.totalorder %s577_s30, %s172_s23 }
  0xbe   : > { %p582_p13 = por %p581_p5, %p580_p12 }
  0xc0   : > { %p584_p1 = por %p583_p0, %p582_p13 }
  0xc2   : > { %p585_p2 = pnand %p584_p1, %p578_p11 }
  0xc4   : > { %588 = shalt.err (!%p585_p2)  }
  0xc5   : > { %s589_s17 = scalar_lea.vmem %s183_s11, 16  ;;  %p594_p4 = scmp.lt.s32.totalorder %s183_s11, %s777_s10 }
  0xc6   : > { %p590_p3 = scmp.ne.s32.totalorder %s183_s11, %s589_s17  ;;  %p595_p6 = scmp.lt.s32.totalorder %s780_s12, %s589_s17 }
  0xc8   : > { %p596_p8 = por %p595_p6, %p594_p4 }
  0xca   : > { %p597_p10 = pnand %p596_p8, %p590_p3 }
  0xcc   : > { %600 = shalt.err (!%p597_p10)  }
  0xcd   : > { %185 = dma.hbm_to_vmem [thread:$0]  %s172_s23, 16, %s183_s11, [#allocation2 + $0x7] }
  0xce   : > { %643 = dma.done.wait [#allocation2], 16 }
  0xcf   : > { %644 = vsyncadd [#allocation2], 4294967280 }
  0xd0   : > { %645 = dma.done.wait [#allocation2 + $0x1], 16 }
  0xd1   : > { %646 = vsyncadd [#allocation2 + $0x1], 4294967280 }
  0xd2   : > { %647 = dma.done.wait [#allocation2 + $0x2], 16 }
  0xd3   : > { %648 = vsyncadd [#allocation2 + $0x2], 4294967280 }
  0xd4   : > { %649 = dma.done.wait [#allocation2 + $0x3], 16 }
  0xd5   : > { %650 = vsyncadd [#allocation2 + $0x3], 4294967280 }
  0xd6   : > { %651 = dma.done.wait [#allocation2 + $0x4], 16 }
  0xd7   : > { %652 = vsyncadd [#allocation2 + $0x4], 4294967280 }
  0xd8   : > { %653 = dma.done.wait [#allocation2 + $0x5], 16 }
  0xd9   : > { %654 = vsyncadd [#allocation2 + $0x5], 4294967280 }
  0xda   : > { %655 = dma.done.wait [#allocation2 + $0x6], 16 }
  0xdb   : > { %656 = vsyncadd [#allocation2 + $0x6], 4294967280 }
  0xdc   : > { %657 = dma.done.wait [#allocation2 + $0x7], 16 }
  0xdd   : > { %658 = vsyncadd [#allocation2 + $0x7], 4294967280  ;;  %s356_s24 = sshll.u32 %s673_s21, 7  ;;  %v211_v0 = vld [vmem:[%s749_s5] sm:$0xff]  ;;  %s935_s0 = sand.u32 1, %s669_s20  }
  0xde   : > { %v212_v1 = vmul.f32 5.656854, %v211_v0  ;;  %s226_s11 = scalar_lea.hbm %s929_s2, %s356_s24  ;;  %s215_s16 = scalar_lea.sflag [#allocation6], %s935_s0 }
  0xdf   : > { %s601_s9 = scalar_lea.vmem %s754_s6, 128  ;;  %p936_p0 = scmp.lt.s32.totalorder %s754_s6, %s777_s10 }
  0xe0   : > { %213 = vst [vmem:[%s749_s5] sm:$0xff] %v212_v1  ;;  %p602_p11 = scmp.ne.s32.totalorder %s754_s6, %s601_s9  ;;  %p609_p13 = scmp.lt.s32.totalorder %s780_s12, %s601_s9 }
  0xe2   : > { %p603_p12 = pnand %p602_p11, %p732_p7  ;;  %p610_p1 = por %p609_p13, %p936_p0 }
  0xe4   : > { %p604_p5 = pneg %p603_p12 }
  0xe6   : > { %p611_p2 = pnand %p610_p1, %p604_p5 }
  0xe8   : > { %614 = shalt.err (!%p611_p2)
}
  0xe9   : > { %s615_s28 = scalar_lea.hbm %s226_s11, 128  ;;  %s619_s8 = scalar_lea.hbm %s929_s2, 256 }
  0xea   : > { %p616_p3 = scmp.ne.s32.totalorder %s226_s11, %s615_s28  ;;  %p620_p8 = scmp.lt.u32.totalorder %s226_s11, %s929_s2 }
  0xeb   : > { %p621_p10 = scmp.lt.u32.totalorder %s619_s8, %s615_s28  ;;  %p623_p12 = scmp.lt.u32.totalorder %s615_s28, %s226_s11 }
  0xec   : > { %p617_p4 = pnand %p616_p3, %p732_p7 }
  0xed   : > { %p622_p11 = por %p621_p10, %p620_p8 }
  0xee   : > { %p618_p6 = pneg %p617_p4 }
  0xef   : > { %p624_p13 = por %p623_p12, %p622_p11 }
  0xf1   : > { %p625_p5 = pnand %p624_p13, %p618_p6 }
  0xf3   : > { %628 = shalt.err (!%p625_p5)
}
  0xf4   : > { %367 = dma.vmem_to_hbm [thread:$0]  (%p732_p7), %s754_s6, 128, %s226_s11, %s215_s16  }
  0xf5 PF: > { %p373_p0 = scmp.ge.s32.totalorder %s673_s21, 1  ;;  %s240_s10 = sand.u32 1, %s665_s19  }
  0xf6   : > { %s241_s12 = scalar_lea.sflag [#allocation6], %s240_s10 }
  0xf7   : > { %p370_p1 = pnand %p373_p0, %p736_p9 }
  0xf9   : > { %660 = dma.done.wait (!%p370_p1), %s241_s12, 128  }
  0xfa   : > { %662 = vsyncadd (!%p370_p1), %s241_s12, 4294967168  ;;  %s937_s14 = sld [smem:[#allocation35_spill]]  ;;  %p16_p2 = scmp.ge.s32.totalorder %s721_s22, 3  }
  0xfb   : > { %s938_s19 = smov %s669_s20  ;;  %s940_s21 = smov %s721_s22 }
  0xfc   :  { %18 = sbr.rel (!%p16_p2) target bundleno = 15 (0xf), region = 105 }
 0x100   : > { %s939_s20 = smov %s937_s14 }
 0x103   :  { %246 = vsyncpa [#allocation6], 1 }
 0x104   :  { %248 = vsyncpa [#allocation6 + $0x1], 1 }
 0x105   :  { %249 = vsyncmov [#allocation2] }
 0x108   :  { %s250_s21 = vpop.sfrf %249 }
 0x109   :  { %p359_p7 = scmp.ne.s32.totalorder %s250_s21, 0 }
 0x10b   :  { %254 = shalt.err (%p359_p7)  }
 0x10c   :  { %256 = vsyncmov [#allocation2 + $0x1] }
 0x10f   :  { %s257_s26 = vpop.sfrf %256 }
 0x110   :  { %p360_p9 = scmp.ne.s32.totalorder %s257_s26, 0 }
 0x112   :  { %261 = shalt.err (%p360_p9)  }
 0x113   :  { %263 = vsyncmov [#allocation2 + $0x2] }
 0x116   :  { %s264_s27 = vpop.sfrf %263 }
 0x117   :  { %p361_p3 = scmp.ne.s32.totalorder %s264_s27, 0 }
 0x119   :  { %268 = shalt.err (%p361_p3)  }
 0x11a   :  { %270 = vsyncmov [#allocation2 + $0x3] }
 0x11d   :  { %s271_s6 = vpop.sfrf %270 }
 0x11e   :  { %p362_p4 = scmp.ne.s32.totalorder %s271_s6, 0 }
 0x120   :  { %275 = shalt.err (%p362_p4)  }
 0x121   :  { %277 = vsyncmov [#allocation2 + $0x4] }
 0x124   :  { %s278_s22 = vpop.sfrf %277 }
 0x125   :  { %p363_p6 = scmp.ne.s32.totalorder %s278_s22, 0 }
 0x127   :  { %282 = shalt.err (%p363_p6)  }
 0x128   :  { %284 = vsyncmov [#allocation2 + $0x5] }
 0x12b   :  { %s285_s1 = vpop.sfrf %284 }
 0x12c   :  { %p364_p8 = scmp.ne.s32.totalorder %s285_s1, 0 }
 0x12e   :  { %289 = shalt.err (%p364_p8)  }
 0x12f   :  { %291 = vsyncmov [#allocation2 + $0x6] }
 0x132   :  { %s292_s2 = vpop.sfrf %291 }
 0x133   :  { %p365_p10 = scmp.ne.s32.totalorder %s292_s2, 0 }
 0x135   :  { %296 = shalt.err (%p365_p10)  }
 0x136   :  { %298 = vsyncmov [#allocation2 + $0x7] }
 0x139   :  { %s299_s19 = vpop.sfrf %298 }
 0x13a   :  { %p366_p11 = scmp.ne.s32.totalorder %s299_s19, 0 }
 0x13c   :  { %303 = shalt.err (%p366_p11)  }

</bundles_post_ra>
